<compile_context>
chip_gen: v6e
topology: v6e:2x2x1
jax: 0.10.0
libtpu: 0.0.40
codegen_flags: <defaults>
</compile_context>

<pallas_src>
import functools

import jax
import jax.numpy as jnp
from jax.experimental import pallas as pl
from jax.experimental.pallas import tpu as pltpu

BN_EPS = 1e-5
LANE = 128
ROW_TILE_CAP = 1024


def _round_up(x, m):
    return (x + m - 1) // m * m


def _row_tile(n):
    # big tiles amortize the ~0.35us fixed per-step cost; keep a multiple of 32
    # (safe sublane packing for bf16 inputs).
    return min(ROW_TILE_CAP, _round_up(max(n, 1), 32))


# ------------------------- pass 1: BN statistics only -------------------------

def _stats_kernel(x_ref, w_ref, p_ref):
    """Per-tile partial [sum; sum-of-squares] over rows of x @ w.

    No bias and zero-padded rows -> padded rows contribute exactly 0, so no
    masking is needed.  No y writeback (recomputed in pass 2)."""
    y = jnp.dot(x_ref[...], w_ref[...], preferred_element_type=jnp.float32)
    s = jnp.sum(y, axis=0, keepdims=True)
    sq = jnp.sum(y * y, axis=0, keepdims=True)
    p_ref[...] = jnp.concatenate([s, sq], axis=0).reshape(1, 2, -1)


def bn_batch_stats(x_bf16, w_pad):
    """x_bf16: [n, cin] bf16 (unpadded channels), w_pad: [cin, cout_pad] bf16.
    Returns [2, cout_pad] f32 = (sum, sumsq) of x @ w over the n rows."""
    n, cin = x_bf16.shape
    cout_pad = w_pad.shape[1]
    tn = _row_tile(n)
    n_pad = _round_up(n, tn)
    x_p = jnp.pad(x_bf16, ((0, n_pad - n), (0, 0)))
    t = n_pad // tn

    partials = pl.pallas_call(
        _stats_kernel,
        out_shape=jax.ShapeDtypeStruct((t, 2, cout_pad), jnp.float32),
        grid=(t,),
        in_specs=[
            pl.BlockSpec((tn, cin), lambda i: (i, 0)),
            pl.BlockSpec((cin, cout_pad), lambda i: (0, 0)),
        ],
        out_specs=pl.BlockSpec((1, 2, cout_pad), lambda i: (i, 0, 0)),
        compiler_params=pltpu.CompilerParams(
            dimension_semantics=("parallel",)),
    )(x_p, w_pad)

    # Tiny cross-tile reduction in XLA keeps the row grid megacore-shardable.
    # TODO(synk): sumsq/n - mean^2 can cancel for huge N / large activation
    #             means; a shifted (Welford-style) partial would be more robust.
    return jnp.sum(partials, axis=0)          # [2, cout_pad]


# ------------- pass 2: recompute matmuls + BN affine + ReLU + add -------------

def _unpool_kernel(xg_ref, xs_ref, wc_ref, ws_ref, stc_ref, gbc_ref,
                   sts_ref, gbs_ref, o_ref, *, n_coarse, n_skip):
    """out = relu(bn_c(x_gathered @ Wc)) + relu(bn_s(x_skip @ Ws))."""

    def affine(st_ref, gb_ref, n):
        inv_n = 1.0 / n
        mean = st_ref[0:1, :] * inv_n
        var = jnp.maximum(st_ref[1:2, :] * inv_n - mean * mean, 0.0)
        inv_std = jax.lax.rsqrt(var + BN_EPS)
        scale = gb_ref[0:1, :] * inv_std
        shift = gb_ref[1:2, :] - mean * scale
        return scale, shift

    # recomputed per tile (a handful of (1, C) VPU/EUP ops) so the row grid
    # axis can stay "parallel" (megacore-safe on v7x, no resident state).
    sc_c, sh_c = affine(stc_ref, gbc_ref, n_coarse)
    sc_s, sh_s = affine(sts_ref, gbs_ref, n_skip)

    yc = jnp.dot(xg_ref[...], wc_ref[...], preferred_element_type=jnp.float32)
    ys = jnp.dot(xs_ref[...], ws_ref[...], preferred_element_type=jnp.float32)
    o_ref[...] = (jnp.maximum(yc * sc_c + sh_c, 0.0)
                  + jnp.maximum(ys * sc_s + sh_s, 0.0))


def unpool_fused(xg_bf16, xs_bf16, w_c, w_s, stats_c, gb_c, stats_s, gb_s,
                 *, n_coarse, n_skip):
    ns, cs = xs_bf16.shape
    cin = xg_bf16.shape[1]
    cout_pad = w_c.shape[1]
    tn = _row_tile(ns)
    ns_pad = _round_up(ns, tn)
    xg_p = jnp.pad(xg_bf16, ((0, ns_pad - ns), (0, 0)))
    xs_p = jnp.pad(xs_bf16, ((0, ns_pad - ns), (0, 0)))

    const = lambda i: (0, 0)
    out = pl.pallas_call(
        functools.partial(_unpool_kernel, n_coarse=n_coarse, n_skip=n_skip),
        out_shape=jax.ShapeDtypeStruct((ns_pad, cout_pad), jnp.float32),
        grid=(ns_pad // tn,),
        in_specs=[
            pl.BlockSpec((tn, cin), lambda i: (i, 0)),
            pl.BlockSpec((tn, cs), lambda i: (i, 0)),
            pl.BlockSpec((cin, cout_pad), const),
            pl.BlockSpec((cs, cout_pad), const),
            pl.BlockSpec((2, cout_pad), const),
            pl.BlockSpec((2, cout_pad), const),
            pl.BlockSpec((2, cout_pad), const),
            pl.BlockSpec((2, cout_pad), const),
        ],
        out_specs=pl.BlockSpec((tn, cout_pad), lambda i: (i, 0)),
        compiler_params=pltpu.CompilerParams(
            dimension_semantics=("parallel",)),
    )(xg_p, xs_p, w_c, w_s, stats_c, gb_c, stats_s, gb_s)
    return out[:ns]


# ----------------------------- module forward -----------------------------

def unpool_with_skip(params, points, skip_points, cluster):
    """UnpoolWithSkip.forward (backend='map', skip=True), train-mode BN."""
    coord, feat, offset = points
    skip_coord, skip_feat, skip_offset = skip_points
    nc, ns = feat.shape[0], skip_feat.shape[0]
    c_out = params["out_channels"]

    feat_bf = feat.astype(jnp.bfloat16)
    skip_bf = skip_feat.astype(jnp.bfloat16)

    # pass 1: batch-norm statistics of each projection (no y materialization).
    # The Linear bias is omitted: a per-channel constant is cancelled exactly
    # by the BN mean subtraction, so the forward output is unchanged.
    stats_c = bn_batch_stats(feat_bf, params["proj_w"])
    stats_s = bn_batch_stats(skip_bf, params["skip_w"])

    # map-unpool gather on the *narrow* bf16 input rows (matmul / BN-affine /
    # ReLU all commute with a row gather).
    feat_g = jnp.take(feat_bf, cluster, axis=0)

    out = unpool_fused(feat_g, skip_bf,
                       params["proj_w"], params["skip_w"],
                       stats_c, params["proj_gb"],
                       stats_s, params["skip_gb"],
                       n_coarse=nc, n_skip=ns)
    return [skip_coord, out[:, :c_out], skip_offset]


# ----------------------------- params & reference -----------------------------

def make_params(key, in_ch, skip_ch, out_ch):
    k = jax.random.split(key, 8)
    cpad = _round_up(out_ch, LANE)

    raw = {
        "proj_w": jax.random.normal(k[0], (in_ch, out_ch), jnp.float32) * 0.1,
        "proj_b": jax.random.normal(k[1], (out_ch,), jnp.float32) * 0.1,
        "proj_gamma": jax.random.uniform(k[2], (out_ch,), jnp.float32, 0.5, 1.5),
        "proj_beta": jax.random.normal(k[3], (out_ch,), jnp.float32) * 0.1,
        "skip_w": jax.random.normal(k[4], (skip_ch, out_ch), jnp.float32) * 0.1,
        "skip_b": jax.random.normal(k[5], (out_ch,), jnp.float32) * 0.1,
        "skip_gamma": jax.random.uniform(k[6], (out_ch,), jnp.float32, 0.5, 1.5),
        "skip_beta": jax.random.normal(k[7], (out_ch,), jnp.float32) * 0.1,
    }

    def pad_w(w):
        # pad only the output (lane) dim to 128; keep cin unpadded
        return jnp.pad(w, ((0, 0), (0, cpad - w.shape[1]))).astype(jnp.bfloat16)

    def pad_vec(v):
        return jnp.pad(v, (0, cpad - v.shape[0]))

    return {
        "out_channels": out_ch,
        "proj_w": pad_w(raw["proj_w"]),
        "proj_gb": jnp.stack([pad_vec(raw["proj_gamma"]),
                              pad_vec(raw["proj_beta"])], axis=0),
        "skip_w": pad_w(raw["skip_w"]),
        "skip_gb": jnp.stack([pad_vec(raw["skip_gamma"]),
                              pad_vec(raw["skip_beta"])], axis=0),
        "raw": raw,
    }


def reference_forward(raw, feat, skip_feat, cluster):
    """Pure-JAX f32 reference mirroring the PyTorch module (train-mode BN).
    Note: the reference keeps the Linear bias; the kernel drops it (it is
    cancelled by the BN mean subtraction), so matching outputs validate that."""
    def branch(x, w, b, g, beta):
        y = x @ w + b
        mean = jnp.mean(y, axis=0)
        var = jnp.mean((y - mean) ** 2, axis=0)      # biased, as BN uses for norm
        yh = (y - mean) * jax.lax.rsqrt(var + BN_EPS)
        return jnp.maximum(yh * g + beta, 0.0)

    up = branch(feat, raw["proj_w"], raw["proj_b"],
                raw["proj_gamma"], raw["proj_beta"])[cluster]
    sk = branch(skip_feat, raw["skip_w"], raw["skip_b"],
                raw["skip_gamma"], raw["skip_beta"])
    return up + sk


# ----------------------------- demo -----------------------------

if __name__ == "__main__":
    key = jax.random.PRNGKey(0)
    in_ch, skip_ch, out_ch = 64, 32, 32
    n_coarse, n_skip = 64, 128

    kf, ks, kc1, kc2, kx1, kx2, kp = jax.random.split(key, 7)
    coarse_coord = jax.random.uniform(kx1, (n_coarse, 3), jnp.float32, 0.0, 2.0)
    coarse_feat = jax.random.normal(kf, (n_coarse, in_ch), jnp.float32)
    coarse_offset = jnp.array([32, 64], jnp.int32)
    skip_coord = jax.random.uniform(kx2, (n_skip, 3), jnp.float32, 0.0, 2.0)
    skip_feat = jax.random.normal(ks, (n_skip, skip_ch), jnp.float32)
    skip_offset = jnp.array([64, 128], jnp.int32)
    # map each fine (skip) point to its coarse parent, respecting batch boundaries
    cluster = jnp.concatenate([
        jax.random.randint(kc1, (64,), 0, 32),
        jax.random.randint(kc2, (64,), 32, 64),
    ]).astype(jnp.int32)

    params = make_params(kp, in_ch, skip_ch, out_ch)

    out_coord, out_feat, out_offset = unpool_with_skip(
        params,
        [coarse_coord, coarse_feat, coarse_offset],
        [skip_coord, skip_feat, skip_offset],
        cluster)
    jax.block_until_ready(out_feat)

    ref = reference_forward(params["raw"], coarse_feat, skip_feat, cluster)

    assert out_feat.shape == (n_skip, out_ch)
    assert bool(jnp.all(jnp.isfinite(out_feat)))
    max_err = float(jnp.max(jnp.abs(out_feat - ref)))
    # bf16 matmul operands (f32 accumulate) vs f32 reference -> loose tolerance
    assert max_err < 7.5e-2, f"max abs error vs reference: {max_err}"
    print("KERNEL_OK")
</pallas_src>

<mosaic_0001>
module attributes {stable_mosaic.version = 11 : i64} {
  func.func @_stats_kernel(%arg0: i32, %arg1: memref<64x64xbf16, #tpu.memory_space<vmem>>, %arg2: memref<64x128xbf16, #tpu.memory_space<vmem>>, %arg3: memref<1x2x128xf32, #tpu.memory_space<vmem>>) attributes {dimension_semantics = [#tpu.dimension_semantics<parallel>], iteration_bounds = array<i64: 1>, scalar_prefetch = 0 : i64, scratch_operands = 0 : i64, tpu.core_type = #tpu.core_type<tc>, window_params = [{transform_indices = @transform_0, window_bounds = array<i64: 64, 64>}, {pipeline_mode = #tpu.pipeline_mode<synchronous>, transform_indices = @transform_1, window_bounds = array<i64: 64, 128>}, {transform_indices = @transform_2, window_bounds = array<i64: 1, 2, 128>}]} {
    %c0 = arith.constant 0 : index
    %c0_0 = arith.constant 0 : index
    %0 = vector.load %arg1[%c0, %c0_0] : memref<64x64xbf16, #tpu.memory_space<vmem>>, vector<64x64xbf16>
    %c0_1 = arith.constant 0 : index
    %c0_2 = arith.constant 0 : index
    %1 = vector.load %arg2[%c0_1, %c0_2] : memref<64x128xbf16, #tpu.memory_space<vmem>>, vector<64x128xbf16>
    %cst = arith.constant dense<0.000000e+00> : vector<64x128xf32>
    %2 = tpu.matmul %0, %1, %cst {dimension_numbers = #tpu.dot_dimension_numbers<[1], [0], [0], [1], [0, 0, 1, 1], [], []>} : vector<64x64xbf16>, vector<64x128xbf16>, vector<64x128xf32> -> vector<64x128xf32>
    %cst_3 = arith.constant dense<0.000000e+00> : vector<128xf32>
    %3 = vector.multi_reduction <add>, %2, %cst_3 [0] : vector<64x128xf32> to vector<128xf32>
    %4 = vector.shape_cast %3 : vector<128xf32> to vector<1x128xf32>
    %5 = arith.mulf %2, %2 : vector<64x128xf32>
    %cst_4 = arith.constant dense<0.000000e+00> : vector<128xf32>
    %6 = vector.multi_reduction <add>, %5, %cst_4 [0] : vector<64x128xf32> to vector<128xf32>
    %7 = vector.shape_cast %6 : vector<128xf32> to vector<1x128xf32>
    %8 = tpu.concatenate %4, %7 in 0 : vector<1x128xf32>, vector<1x128xf32> -> vector<2x128xf32>
    %9 = vector.shape_cast %8 : vector<2x128xf32> to vector<1x2x128xf32>
    %c0_5 = arith.constant 0 : index
    %c0_6 = arith.constant 0 : index
    %c0_7 = arith.constant 0 : index
    %10 = vector.load %arg3[%c0_5, %c0_6, %c0_7] : memref<1x2x128xf32, #tpu.memory_space<vmem>>, vector<1x2x128xf32>
    tpu.vector_store %arg3[%c0_5, %c0_6, %c0_7], %9 {strides = array<i32>} : memref<1x2x128xf32, #tpu.memory_space<vmem>>, vector<1x2x128xf32>,
    return
  }
  func.func @transform_0(%arg0: i32) -> (i32, i32) {
    %c0_i32 = arith.constant 0 : i32
    %c0_i32_0 = arith.constant 0 : i32
    return %arg0, %c0_i32 : i32, i32
  }
  func.func @transform_1(%arg0: i32) -> (i32, i32) {
    %c0_i32 = arith.constant 0 : i32
    %c0_i32_0 = arith.constant 0 : i32
    %c0_i32_1 = arith.constant 0 : i32
    return %c0_i32, %c0_i32_0 : i32, i32
  }
  func.func @transform_2(%arg0: i32) -> (i32, i32, i32) {
    %c0_i32 = arith.constant 0 : i32
    %c0_i32_0 = arith.constant 0 : i32
    %c0_i32_1 = arith.constant 0 : i32
    return %arg0, %c0_i32, %c0_i32_0 : i32, i32, i32
  }
}

</mosaic_0001>

<bundles_post_ra>
// kernel: tpu_custom_call.1
= control target key start
LH: loop header
LB: loop body
LE: loop exit
PB: predicated region body
PF: predicated region fallthrough
CT: control target
= control target key end

     0   :  { %7 = vsyncpa [#allocation3], 0  ;;  %s388_s0 = inlined_call_operand.hbm [shape: bf16[64,64], index: 0, kind: input, shape index: {}]   ;;  %s389_s1 = inlined_call_operand.hbm [shape: bf16[64,128], index: 1, kind: input, shape index: {}]   ;;  %s390_s2 = inlined_call_operand.hbm [shape: f32[1,2,128], index: 2, kind: output, shape index: {}]  }
   0x1   :  { %8 = vsyncpa [#allocation6], 0 }
   0x2   :  { %9 = vsyncpa [#allocation4], 0  ;;  %s355_s9 = smov [#allocation2]  }
   0x3   :  { %s15_s10 = sshll.u32 %s355_s9, 4  ;;  %s16_s10 = int_to_ptr.vmem [resolvable:$true] %s15_s10 }
   0x4   :  { %s297_s11 = scalar_lea.vmem %s16_s10, 512  ;;  %p302_p1 = scmp.lt.s32.totalorder %s16_s10, %s16_s10 }
   0x5   :  { %p298_p0 = scmp.ne.s32.totalorder %s16_s10, %s297_s11  ;;  %p303_p2 = scmp.lt.s32.totalorder %s297_s11, %s297_s11 }
   0x7   :  { %p304_p3 = por %p303_p2, %p302_p1 }
   0x9   :  { %p305_p4 = pnand %p304_p3, %p298_p0 }
   0xb   :  { %308 = shalt.err (!%p305_p4)
}
   0xc   :  { %s356_s12 = smov 64   ;;  %s357_s13 = smov 4  }
   0xd   :  { %21 = dma.hbm_to_vmem [thread:$0]  %s388_s0, 512, %s16_s10, [#allocation3], %s356_s12, %s356_s12, %s357_s13  }
   0xe   :  { %s358_s16 = smov [#allocation5]  }
   0xf   :  { %s27_s17 = sshll.u32 %s358_s16, 4  ;;  %s28_s17 = int_to_ptr.vmem [resolvable:$true] %s27_s17 }
  0x10   :  { %s317_s18 = scalar_lea.vmem %s28_s17, 512  ;;  %p322_p6 = scmp.lt.s32.totalorder %s28_s17, %s28_s17 }
  0x11   :  { %p318_p5 = scmp.ne.s32.totalorder %s28_s17, %s317_s18  ;;  %p323_p7 = scmp.lt.s32.totalorder %s317_s18, %s317_s18 }
  0x13   :  { %p324_p8 = por %p323_p7, %p322_p6 }
  0x15   :  { %p325_p9 = pnand %p324_p8, %p318_p5 }
  0x17   :  { %328 = shalt.err (!%p325_p9)
}
  0x18   :  { %33 = dma.hbm_to_vmem [thread:$0]  %s389_s1, 512, %s28_s17, [#allocation6], %s356_s12, %s356_s12, %s357_s13  }
  0x19   :  { %349 = dma.done.wait [#allocation3], 512  }
  0x1a   :  { %350 = vsyncadd [#allocation3], 4294966784 }
  0x1b   :  { %351 = dma.done.wait [#allocation6], 512  }
  0x1c   :  { %352 = vsyncadd [#allocation6], 4294966784  ;;  %v281_v0 = vld [vmem:[#allocation5 + $0x18] sm:$0xff]   ;;  %v282_v1 = vld [vmem:[#allocation5 + $0x10] sm:$0xff]   ;;  %vm101_vm0 = vcmask 523264   ;;  %s359_s0 = smov [#allocation7]  }
  0x1d   :  { %252 = vmatprep.subr.bf16.mxu0 %v281_v0  ;;  %268 = vmatprep.subr.bf16.mxu1 %v281_v0  ;;  %v283_v2 = vld [vmem:[#allocation5 + $0x8] sm:$0xff]   ;;  %v285_v3 = vld [vmem:[#allocation2] sm:$0xff]   ;;  %v287_v4 = vld [vmem:[#allocation2 + $0x10] sm:$0xff]   ;;  %s222_s1 = sshll.u32 %s359_s0, 4  ;;  %vm213_vm1 = vcmask 1040384   ;;  %s223_s1 = int_to_ptr.vmem [resolvable:$true] %s222_s1 }
  0x1e   :  { %253 = vmatpush3.bf16.msra.mxu0 %v281_v0  ;;  %272 = vmatpush3.bf16.msra.mxu1 %v281_v0  ;;  %v284_v5 = vld [vmem:[#allocation5] sm:$0xff]   ;;  %v286_v6 = vld [vmem:[#allocation2 + $0x8] sm:$0xff]   ;;  %v288_v7 = vld [vmem:[#allocation2 + $0x18] sm:$0xff]   ;;  %s329_s21 = scalar_lea.vmem %s223_s1, 32  ;;  %p334_p11 = scmp.lt.s32.totalorder %s223_s1, %s223_s1 }
  0x1f   :  { %254 = vmatprep.subr.bf16.mxu0 %v282_v1  ;;  %269 = vmatprep.subr.bf16.mxu1 %v282_v1  ;;  %p330_p10 = scmp.ne.s32.totalorder %s223_s1, %s329_s21  ;;  %p335_p12 = scmp.lt.s32.totalorder %s329_s21, %s329_s21 }
  0x20   :  { %260 = vmatprep.mubr.msk.bf16.mxu0 %vm101_vm0, %v285_v3  ;;  %264 = vmatprep.mubr.msk.bf16.mxu1 %vm101_vm0, %v287_v4 }
  0x21   :  { %p336_p13 = por %p335_p12, %p334_p11 }
  0x22   :  { %255 = vmatpush3.bf16.msra.mxu0 %v282_v1  ;;  %273 = vmatpush3.bf16.msra.mxu1 %v282_v1 }
  0x23   :  { %256 = vmatprep.subr.bf16.mxu0 %v283_v2  ;;  %270 = vmatprep.subr.bf16.mxu1 %v283_v2  ;;  %p337_p0 = pnand %p336_p13, %p330_p10 }
  0x26   :  { %257 = vmatpush3.bf16.msra.mxu0 %v283_v2  ;;  %274 = vmatpush3.bf16.msra.mxu1 %v283_v2 }
  0x27   :  { %258 = vmatprep.subr.bf16.mxu0 %v284_v5  ;;  %271 = vmatprep.subr.bf16.mxu1 %v284_v5 }
  0x2a   :  { %259 = vmatpush3.bf16.msra.mxu0 %v284_v5  ;;  %275 = vmatpush3.bf16.msra.mxu1 %v284_v5 }
  0x2d   :  { %261 = vmatmul.mubr.msk.bf16.vlgmr.msra.gmra.mxu0 %vm101_vm0, %v286_v6  ;;  %265 = vmatmul.mubr.msk.bf16.vlgmr.msra.gmra.mxu1 %vm101_vm0, %v288_v7 }
  0xed   :  { %v262_v8 = vpop.f32.mrf.mxu0  ;;  %v266_v9 = vpop.f32.mrf.mxu1 }
  0xee   :  { %v194_v18 = vmul.f32 %v262_v8, %v262_v8  ;;  %v198_v31 = vmul.f32 %v266_v9, %v266_v9 }
  0xef   :  { %v148_v10 = vpop.f32.mrf.mxu0  ;;  %v164_v12 = vpop.f32.mrf.mxu1 }
  0xf0   :  { %v192_v14 = vmul.f32 %v148_v10, %v148_v10  ;;  %v196_v25 = vmul.f32 %v164_v12, %v164_v12 }
  0xf1   :  { %v263_v11 = vpop.f32.mrf.mxu0  ;;  %v267_v17 = vpop.f32.mrf.mxu1 }
  0xf2   :  { %v195_v21 = vmul.f32 %v263_v11, %v263_v11  ;;  %v199_v34 = vmul.f32 %v267_v17, %v267_v17 }
  0xf3   :  { %v151_v13 = vpop.f32.mrf.mxu0  ;;  %v167_v24 = vpop.f32.mrf.mxu1 }
  0xf4   :  { %v179_v15 = vadd.f32 %v151_v13, %v148_v10  ;;  %v193_v16 = vmul.f32 %v151_v13, %v151_v13  ;;  %v197_v29 = vmul.f32 %v167_v24, %v167_v24 }
  0xf6   :  { %v180_v19 = vadd.f32 %v262_v8, %v179_v15  ;;  %v200_v20 = vadd.f32 %v193_v16, %v192_v14 }
  0xf8   :  { %v201_v22 = vadd.f32 %v200_v20, %v194_v18  ;;  %v181_v23 = vadd.f32 %v263_v11, %v180_v19 }
  0xfa   :  { %v182_v26 = vadd.f32 %v181_v23, %v164_v12  ;;  %v202_v27 = vadd.f32 %v201_v22, %v195_v21 }
  0xfc   :  { %v183_v28 = vadd.f32 %v182_v26, %v167_v24  ;;  %v203_v30 = vadd.f32 %v202_v27, %v196_v25 }
  0xfe   :  { %v184_v32 = vadd.f32 %v266_v9, %v183_v28  ;;  %v204_v33 = vadd.f32 %v203_v30, %v197_v29 }
 0x100   :  { %v185_v35 = vadd.f32 %v267_v17, %v184_v32  ;;  %v205_v36 = vadd.f32 %v204_v33, %v198_v31 }
 0x102   :  { %v186_v37 = vrot.slane %v185_v35, 4  ;;  %v206_v38 = vadd.f32 %v205_v36, %v199_v34 }
 0x104   :  { %v187_v39 = vadd.f32 %v186_v37, %v185_v35  ;;  %v207_v40 = vrot.slane %v206_v38, 4 }
 0x106   :  { %v188_v41 = vrot.slane %v187_v39, 2  ;;  %v208_v42 = vadd.f32 %v207_v40, %v206_v38 }
 0x108   :  { %v189_v43 = vadd.f32 %v188_v41, %v187_v39  ;;  %v209_v44 = vrot.slane %v208_v42, 2 }
 0x10a   :  { %v190_v45 = vrot.slane %v189_v43, 1  ;;  %v210_v46 = vadd.f32 %v209_v44, %v208_v42 }
 0x10c   :  { %v211_v47 = vrot.slane %v210_v46, 1  ;;  %v191_v48 = vadd.f32 %v190_v45, %v189_v43 }
 0x10e   :  { %v212_v49 = vadd.f32 %v211_v47, %v210_v46 }
 0x110   :  { %v214_v50 = vsel %vm213_vm1, %v191_v48, %v212_v49 }
 0x111   :  { %215 = vst [vmem:[#allocation7] sm:$0x3] %v214_v50 }
 0x112   :  { %340 = shalt.err (!%p337_p0)
}
 0x113   :  { %225 = dma.vmem_to_hbm [thread:$0]  %s223_s1, 32, %s390_s2, [#allocation4]  }
 0x114   :  { %353 = dma.done.wait [#allocation4], 32  }
 0x115   :  { %354 = vsyncadd [#allocation4], 4294967264 }
 0x116   :  { %229 = vsyncpa [#allocation3], 1 }
 0x117   :  { %230 = vsyncpa [#allocation6], 1 }
 0x118   :  { %231 = vsyncpa [#allocation4], 1 }

</bundles_post_ra>
